<compile_context>
chip_gen: v7x
topology: tpu7x:2x2x1
jax: 0.10.0
libtpu: 0.0.40
codegen_flags: <defaults>
</compile_context>

<pallas_src>
import functools
import math

import jax
import jax.numpy as jnp
from jax import lax
from jax.experimental import pallas as pl
from jax.experimental.pallas import tpu as pltpu

# Safe scoped-VMEM budget across v5e / v6e / v7x (tiles below are sized well under it).
VMEM_LIMIT = 32 * 1024 * 1024
LN_EPS = 1e-12


def _pick_tile(dim, pref):
    """Prefer `pref`-sized tiles when they divide `dim`; otherwise take the full dim."""
    return pref if (dim > pref and dim % pref == 0) else dim


def _activate(y, act):
    if act == "relu":
        return jnp.maximum(y, 0.0)
    if act == "tanh":
        return jnp.tanh(y)
    if act == "gelu":
        # TODO(synk): HF BERT uses exact erf GELU; tanh approximation used here for
        # robust Mosaic lowering (~1e-3 relative difference).
        c = jnp.float32(math.sqrt(2.0 / math.pi))
        return 0.5 * y * (1.0 + jnp.tanh(c * (y + 0.044715 * y * y * y)))
    return y


def _layernorm_f32(z, g, b):
    mean = jnp.mean(z, axis=-1, keepdims=True)
    zc = z - mean
    var = jnp.mean(zc * zc, axis=-1, keepdims=True)
    return zc * lax.rsqrt(var + LN_EPS) * g + b


# ----------------------------------------------------------------------------
# Tiled linear:  o = act(x @ w + b)
# ----------------------------------------------------------------------------

def _linear_kernel(x_ref, w_ref, b_ref, o_ref, acc_ref, *, act, nk):
    @pl.when(pl.program_id(2) == 0)
    def _():
        acc_ref[...] = jnp.zeros_like(acc_ref)

    acc_ref[...] += jnp.dot(x_ref[...], w_ref[...],
                            preferred_element_type=jnp.float32)

    @pl.when(pl.program_id(2) == nk - 1)
    def _():
        y = acc_ref[...] + b_ref[...]
        o_ref[...] = _activate(y, act).astype(o_ref.dtype)


def linear(x, w, b, act="none", out_dtype=jnp.bfloat16, tm=256, tn=256, tk=256):
    M, K = x.shape
    N = w.shape[1]
    tm = _pick_tile(M, tm)
    tn = _pick_tile(N, tn)
    tk = _pick_tile(K, tk)
    grid = (M // tm, N // tn, K // tk)
    nk = grid[2]
    flops = 2 * M * N * K
    bytes_accessed = (M * K + K * N) * x.dtype.itemsize + M * N * jnp.dtype(out_dtype).itemsize
    return pl.pallas_call(
        functools.partial(_linear_kernel, act=act, nk=nk),
        out_shape=jax.ShapeDtypeStruct((M, N), out_dtype),
        grid=grid,
        in_specs=[
            pl.BlockSpec((tm, tk), lambda i, j, k: (i, k)),
            pl.BlockSpec((tk, tn), lambda i, j, k: (k, j)),
            pl.BlockSpec((1, tn), lambda i, j, k: (0, j)),
        ],
        out_specs=pl.BlockSpec((tm, tn), lambda i, j, k: (i, j)),
        scratch_shapes=[pltpu.VMEM((tm, tn), jnp.float32)],
        compiler_params=pltpu.CompilerParams(
            dimension_semantics=("parallel", "parallel", "arbitrary"),
            vmem_limit_bytes=VMEM_LIMIT),
        cost_estimate=pl.CostEstimate(flops=int(flops), transcendentals=0,
                                      bytes_accessed=int(bytes_accessed)),
    )(x, w, b.reshape(1, N))


# ----------------------------------------------------------------------------
# Plain LayerNorm (embeddings), tiled over rows
# ----------------------------------------------------------------------------

def _layernorm_kernel(x_ref, g_ref, b_ref, o_ref):
    z = x_ref[...].astype(jnp.float32)
    o_ref[...] = _layernorm_f32(z, g_ref[...], b_ref[...]).astype(o_ref.dtype)


def layernorm(x, g, b, out_dtype=jnp.bfloat16, tm=256):
    M, H = x.shape
    tm = _pick_tile(M, tm)
    return pl.pallas_call(
        _layernorm_kernel,
        out_shape=jax.ShapeDtypeStruct((M, H), out_dtype),
        grid=(M // tm,),
        in_specs=[
            pl.BlockSpec((tm, H), lambda i: (i, 0)),
            pl.BlockSpec((1, H), lambda i: (0, 0)),
            pl.BlockSpec((1, H), lambda i: (0, 0)),
        ],
        out_specs=pl.BlockSpec((tm, H), lambda i: (i, 0)),
        compiler_params=pltpu.CompilerParams(
            dimension_semantics=("parallel",), vmem_limit_bytes=VMEM_LIMIT),
    )(x, g.reshape(1, H), b.reshape(1, H))


# ----------------------------------------------------------------------------
# Fused: attention output projection + bias + residual + LayerNorm
# ----------------------------------------------------------------------------

def _proj_add_ln_kernel(x_ref, w_ref, b_ref, res_ref, g_ref, bln_ref, o_ref):
    y = jnp.dot(x_ref[...], w_ref[...], preferred_element_type=jnp.float32)
    z = y + b_ref[...] + res_ref[...].astype(jnp.float32)
    o_ref[...] = _layernorm_f32(z, g_ref[...], bln_ref[...]).astype(o_ref.dtype)


def proj_add_ln(x, w, b, res, g, bln, out_dtype=jnp.bfloat16, tm=256):
    M, K = x.shape
    N = w.shape[1]
    tm = _pick_tile(M, tm)
    flops = 2 * M * N * K
    bytes_accessed = (M * K + K * N + 2 * M * N) * x.dtype.itemsize
    return pl.pallas_call(
        _proj_add_ln_kernel,
        out_shape=jax.ShapeDtypeStruct((M, N), out_dtype),
        grid=(M // tm,),
        in_specs=[
            pl.BlockSpec((tm, K), lambda i: (i, 0)),
            pl.BlockSpec((K, N), lambda i: (0, 0)),
            pl.BlockSpec((1, N), lambda i: (0, 0)),
            pl.BlockSpec((tm, N), lambda i: (i, 0)),
            pl.BlockSpec((1, N), lambda i: (0, 0)),
            pl.BlockSpec((1, N), lambda i: (0, 0)),
        ],
        out_specs=pl.BlockSpec((tm, N), lambda i: (i, 0)),
        compiler_params=pltpu.CompilerParams(
            dimension_semantics=("parallel",), vmem_limit_bytes=VMEM_LIMIT),
        cost_estimate=pl.CostEstimate(flops=int(flops), transcendentals=0,
                                      bytes_accessed=int(bytes_accessed)),
    )(x, w, b.reshape(1, N), res, g.reshape(1, N), bln.reshape(1, N))


# ----------------------------------------------------------------------------
# Fused FFN: LN( GELU(x@wi+bi) @ wo + bo + residual ) — intermediate stays in VMEM
# ----------------------------------------------------------------------------

def _ffn_add_ln_kernel(x_ref, wi_ref, bi_ref, wo_ref, bo_ref, res_ref,
                       g_ref, bln_ref, o_ref):
    inter = jnp.dot(x_ref[...], wi_ref[...], preferred_element_type=jnp.float32)
    inter = _activate(inter + bi_ref[...], "gelu")
    y = jnp.dot(inter.astype(x_ref.dtype), wo_ref[...],
                preferred_element_type=jnp.float32)
    z = y + bo_ref[...] + res_ref[...].astype(jnp.float32)
    o_ref[...] = _layernorm_f32(z, g_ref[...], bln_ref[...]).astype(o_ref.dtype)


def ffn_add_ln(x, wi, bi, wo, bo, res, g, bln, out_dtype=jnp.bfloat16, tm=256):
    M, H = x.shape
    I = wi.shape[1]
    tm = _pick_tile(M, tm)
    flops = 4 * M * H * I
    bytes_accessed = (2 * H * I + 3 * M * H) * x.dtype.itemsize
    return pl.pallas_call(
        _ffn_add_ln_kernel,
        out_shape=jax.ShapeDtypeStruct((M, H), out_dtype),
        grid=(M // tm,),
        in_specs=[
            pl.BlockSpec((tm, H), lambda i: (i, 0)),
            pl.BlockSpec((H, I), lambda i: (0, 0)),
            pl.BlockSpec((1, I), lambda i: (0, 0)),
            pl.BlockSpec((I, H), lambda i: (0, 0)),
            pl.BlockSpec((1, H), lambda i: (0, 0)),
            pl.BlockSpec((tm, H), lambda i: (i, 0)),
            pl.BlockSpec((1, H), lambda i: (0, 0)),
            pl.BlockSpec((1, H), lambda i: (0, 0)),
        ],
        out_specs=pl.BlockSpec((tm, H), lambda i: (i, 0)),
        compiler_params=pltpu.CompilerParams(
            dimension_semantics=("parallel",), vmem_limit_bytes=VMEM_LIMIT),
        cost_estimate=pl.CostEstimate(flops=int(flops),
                                      transcendentals=int(M * I),
                                      bytes_accessed=int(bytes_accessed)),
    )(x, wi, bi.reshape(1, I), wo, bo.reshape(1, H), res,
      g.reshape(1, H), bln.reshape(1, H))


# ----------------------------------------------------------------------------
# Attention: all heads of one batch per grid step, [B, S, NH, HD] layout
# ----------------------------------------------------------------------------

def _attention_kernel(q_ref, k_ref, v_ref, bias_ref, o_ref, *, scale):
    q = q_ref[0]          # (S, NH, HD) bf16
    k = k_ref[0]
    v = v_ref[0]
    # Batched over heads; contracts last axes — no explicit transpose of K.
    s = jnp.einsum('qhd,khd->hqk', q, k,
                   preferred_element_type=jnp.float32) * scale        # (NH, S, S)
    s = s + bias_ref[...]                                             # (1,1,S) bcast
    m = jnp.max(s, axis=-1, keepdims=True)
    p = jnp.exp(s - m)
    denom = jnp.sum(p, axis=-1, keepdims=True)
    p = p * pl.reciprocal(denom, approx=True)
    ctx = jnp.einsum('hqk,khd->qhd', p.astype(v.dtype), v,
                     preferred_element_type=jnp.float32)              # (S, NH, HD)
    o_ref[0] = ctx.astype(o_ref.dtype)


def attention(q, k, v, bias):
    """q,k,v: (B, S, NH, HD) bf16; bias: (B, 1, S) f32 additive mask."""
    B, S, NH, HD = q.shape
    qkv_spec = pl.BlockSpec((1, S, NH, HD), lambda b: (b, 0, 0, 0))
    flops = 4 * B * NH * S * S * HD
    bytes_accessed = (4 * B * S * NH * HD) * q.dtype.itemsize + B * S * 4
    return pl.pallas_call(
        functools.partial(_attention_kernel, scale=1.0 / math.sqrt(HD)),
        out_shape=jax.ShapeDtypeStruct((B, S, NH, HD), q.dtype),
        grid=(B,),
        in_specs=[
            qkv_spec, qkv_spec, qkv_spec,
            pl.BlockSpec((1, 1, S), lambda b: (b, 0, 0)),
        ],
        out_specs=qkv_spec,
        compiler_params=pltpu.CompilerParams(
            dimension_semantics=("parallel",), vmem_limit_bytes=VMEM_LIMIT),
        cost_estimate=pl.CostEstimate(flops=int(flops),
                                      transcendentals=int(B * NH * S * S),
                                      bytes_accessed=int(bytes_accessed)),
    )(q, k, v, bias)


# ----------------------------------------------------------------------------
# BERT model (gathers / tiny reshapes in JAX glue, hot paths in Pallas kernels)
# ----------------------------------------------------------------------------

def bert_forward(params, input_ids, token_type_ids, attention_mask, cfg):
    B, S = input_ids.shape
    H, NH, HD = cfg["hidden"], cfg["heads"], cfg["head_dim"]
    M = B * S

    # Embeddings (gather is glue) + LayerNorm (Pallas, f32 math -> bf16 stream).
    emb = (params["word_emb"][input_ids]
           + params["pos_emb"][jnp.arange(S)][None, :, :]
           + params["type_emb"][token_type_ids])
    h = layernorm(emb.reshape(M, H), params["emb_ln_g"], params["emb_ln_b"])

    # HF-style extended additive attention mask: (1 - mask) * -10000 (keys only).
    bias = ((1.0 - attention_mask.astype(jnp.float32)) * -10000.0).reshape(B, 1, S)

    for lp in params["layers"]:
        # Fused QKV projection: one (H, 3H) matmul.
        qkv = linear(h, lp["wqkv"], lp["bqkv"])                    # (M, 3H) bf16
        qkv = qkv.reshape(B, S, 3, NH, HD)
        q, k, v = qkv[:, :, 0], qkv[:, :, 1], qkv[:, :, 2]         # (B, S, NH, HD)
        ctx = attention(q, k, v, bias)                             # (B, S, NH, HD)
        ctx2d = ctx.reshape(M, H)                                  # free (layout-preserving)
        # Fused output projection + residual + LayerNorm.
        h = proj_add_ln(ctx2d, lp["wo"], lp["bo"], h, lp["ln1_g"], lp["ln1_b"])
        # Fused FFN (GELU) + residual + LayerNorm; (M, 4H) intermediate stays in VMEM.
        h = ffn_add_ln(h, lp["wi"], lp["bi"], lp["wo2"], lp["bo2"], h,
                       lp["ln2_g"], lp["ln2_b"])

    encoder = h.reshape(B, S, H)
    cls = encoder[:, 0, :]                                         # (B, H)
    pooled = linear(cls, params["pool_w"], params["pool_b"], act="tanh")
    return encoder, pooled


def fc_head(params, pooled, label_num):
    # nn.Dropout layers are identity in eval mode.
    h = pooled
    for (w, b) in params["fc_hidden"]:
        h = linear(h, w, b, act="relu")                            # Linear + ReLU
    w, b = params["fc_out"]
    # Pad the classifier output dim to a full 128-lane slab (lane-dense stores),
    # then slice the real logits back out.
    pad_n = max(128, -(-label_num // 128) * 128)
    w_pad = jnp.pad(w, ((0, 0), (0, pad_n - label_num)))
    b_pad = jnp.pad(b, (0, pad_n - label_num))
    logits = linear(h, w_pad, b_pad, out_dtype=jnp.float32)
    return logits[:, :label_num]


def baseline_bert_forward(params, x, types, masks, cfg):
    """Equivalent of baseline_Bert.forward(x, types, masks) -> logits."""
    _, pooled = bert_forward(params, x, types, masks, cfg)
    return fc_head(params, pooled, cfg["label_num"])


# ----------------------------------------------------------------------------
# Deterministic synthetic parameter initialization (weights bf16, biases/LN f32)
# ----------------------------------------------------------------------------

def init_params(key, cfg):
    H, I = cfg["hidden"], cfg["intermediate"]

    def dense(key, fan_in, fan_out):
        w = 0.02 * jax.random.normal(key, (fan_in, fan_out), jnp.float32)
        return w.astype(jnp.bfloat16)

    keys = iter(jax.random.split(key, 256))
    params = {
        "word_emb": 0.02 * jax.random.normal(next(keys), (cfg["vocab"], H), jnp.float32),
        "pos_emb": 0.02 * jax.random.normal(next(keys), (cfg["max_pos"], H), jnp.float32),
        "type_emb": 0.02 * jax.random.normal(next(keys), (cfg["type_vocab"], H), jnp.float32),
        "emb_ln_g": jnp.ones((H,), jnp.float32),
        "emb_ln_b": jnp.zeros((H,), jnp.float32),
        "layers": [],
        "pool_w": dense(next(keys), H, H),
        "pool_b": jnp.zeros((H,), jnp.float32),
    }
    for _ in range(cfg["layers"]):
        params["layers"].append({
            # Fused QKV weight (equivalent to concat(wq, wk, wv) along output dim).
            "wqkv": dense(next(keys), H, 3 * H),
            "bqkv": jnp.zeros((3 * H,), jnp.float32),
            "wo": dense(next(keys), H, H), "bo": jnp.zeros((H,), jnp.float32),
            "ln1_g": jnp.ones((H,), jnp.float32), "ln1_b": jnp.zeros((H,), jnp.float32),
            "wi": dense(next(keys), H, I), "bi": jnp.zeros((I,), jnp.float32),
            "wo2": dense(next(keys), I, H), "bo2": jnp.zeros((H,), jnp.float32),
            "ln2_g": jnp.ones((H,), jnp.float32), "ln2_b": jnp.zeros((H,), jnp.float32),
        })
    # fc head: (linear_layer_num - 1) hidden Linear+ReLU blocks, then Linear(H, label_num).
    params["fc_hidden"] = [
        (dense(next(keys), H, H), jnp.zeros((H,), jnp.float32))
        for _ in range(cfg["linear_layer_num"] - 1)
    ]
    params["fc_out"] = (dense(next(keys), H, cfg["label_num"]),
                        jnp.zeros((cfg["label_num"],), jnp.float32))
    return params


# ----------------------------------------------------------------------------
# Main
# ----------------------------------------------------------------------------

if __name__ == "__main__":
    cfg = dict(
        hidden=128,          # scaled-down stand-in for BERT's 768
        heads=4,
        head_dim=32,
        intermediate=256,
        layers=2,
        vocab=128,
        type_vocab=2,
        max_pos=64,
        label_num=4,
        linear_layer_num=2,  # fc = Dropout, Linear+ReLU+Dropout, Linear(H, label_num)
    )
    B, S = 2, 8

    key = jax.random.PRNGKey(0)
    kp, kx, kt, km = jax.random.split(key, 4)

    params = init_params(kp, cfg)
    x = jax.random.randint(kx, (B, S), 0, cfg["vocab"], dtype=jnp.int32)
    types = jax.random.randint(kt, (B, S), 0, cfg["type_vocab"], dtype=jnp.int32)
    masks = jnp.concatenate(
        [jnp.ones((B, S - 2), jnp.int32), jnp.zeros((B, 2), jnp.int32)], axis=1)

    logits = baseline_bert_forward(params, x, types, masks, cfg)
    logits = jax.block_until_ready(logits)
    assert logits.shape == (B, cfg["label_num"])
    assert bool(jnp.all(jnp.isfinite(logits)))
    print("KERNEL_OK")
</pallas_src>

<mosaic_0001>
module attributes {stable_mosaic.version = 11 : i64} {
  func.func @_layernorm_kernel(%arg0: i32, %arg1: memref<16x128xf32, #tpu.memory_space<vmem>>, %arg2: memref<1x128xf32, #tpu.memory_space<vmem>>, %arg3: memref<1x128xf32, #tpu.memory_space<vmem>>, %arg4: memref<16x128xbf16, #tpu.memory_space<vmem>>) attributes {dimension_semantics = [#tpu.dimension_semantics<parallel>], iteration_bounds = array<i64: 1>, scalar_prefetch = 0 : i64, scratch_operands = 0 : i64, tpu.core_type = #tpu.core_type<tc>, window_params = [{transform_indices = @transform_0, window_bounds = array<i64: 16, 128>}, {pipeline_mode = #tpu.pipeline_mode<synchronous>, transform_indices = @transform_1, window_bounds = array<i64: 1, 128>}, {pipeline_mode = #tpu.pipeline_mode<synchronous>, transform_indices = @transform_2, window_bounds = array<i64: 1, 128>}, {transform_indices = @transform_3, window_bounds = array<i64: 16, 128>}]} {
    %c0 = arith.constant 0 : index
    %c0_0 = arith.constant 0 : index
    %0 = vector.load %arg1[%c0, %c0_0] : memref<16x128xf32, #tpu.memory_space<vmem>>, vector<16x128xf32>
    %c0_1 = arith.constant 0 : index
    %c0_2 = arith.constant 0 : index
    %1 = vector.load %arg2[%c0_1, %c0_2] : memref<1x128xf32, #tpu.memory_space<vmem>>, vector<1x128xf32>
    %c0_3 = arith.constant 0 : index
    %c0_4 = arith.constant 0 : index
    %2 = vector.load %arg3[%c0_3, %c0_4] : memref<1x128xf32, #tpu.memory_space<vmem>>, vector<1x128xf32>
    %cst = arith.constant dense<0.000000e+00> : vector<16xf32>
    %3 = vector.multi_reduction <add>, %0, %cst [1] : vector<16x128xf32> to vector<16xf32>
    %4 = vector.shape_cast %3 : vector<16xf32> to vector<16x1xf32>
    %cst_5 = arith.constant 1.280000e+02 : f32
    %5 = vector.broadcast %cst_5 : f32 to vector<16x1xf32>
    %6 = arith.divf %4, %5 : vector<16x1xf32>
    %7 = vector.broadcast %6 : vector<16x1xf32> to vector<16x128xf32>
    %8 = arith.subf %0, %7 : vector<16x128xf32>
    %9 = arith.mulf %8, %8 : vector<16x128xf32>
    %cst_6 = arith.constant dense<0.000000e+00> : vector<16xf32>
    %10 = vector.multi_reduction <add>, %9, %cst_6 [1] : vector<16x128xf32> to vector<16xf32>
    %11 = vector.shape_cast %10 : vector<16xf32> to vector<16x1xf32>
    %cst_7 = arith.constant 1.280000e+02 : f32
    %12 = vector.broadcast %cst_7 : f32 to vector<16x1xf32>
    %13 = arith.divf %11, %12 : vector<16x1xf32>
    %cst_8 = arith.constant 9.99999996E-13 : f32
    %14 = vector.broadcast %cst_8 : f32 to vector<16x1xf32>
    %15 = arith.addf %13, %14 : vector<16x1xf32>
    %16 = math.rsqrt %15 : vector<16x1xf32>
    %17 = vector.broadcast %16 : vector<16x1xf32> to vector<16x128xf32>
    %18 = arith.mulf %8, %17 : vector<16x128xf32>
    %19 = vector.broadcast %1 : vector<1x128xf32> to vector<16x128xf32>
    %20 = arith.mulf %18, %19 : vector<16x128xf32>
    %21 = vector.broadcast %2 : vector<1x128xf32> to vector<16x128xf32>
    %22 = arith.addf %20, %21 : vector<16x128xf32>
    %23 = arith.truncf %22 : vector<16x128xf32> to vector<16x128xbf16>
    %c0_9 = arith.constant 0 : index
    %c0_10 = arith.constant 0 : index
    %24 = vector.load %arg4[%c0_9, %c0_10] : memref<16x128xbf16, #tpu.memory_space<vmem>>, vector<16x128xbf16>
    tpu.vector_store %arg4[%c0_9, %c0_10], %23 {strides = array<i32>} : memref<16x128xbf16, #tpu.memory_space<vmem>>, vector<16x128xbf16>,
    return
  }
  func.func @transform_0(%arg0: i32) -> (i32, i32) {
    %c0_i32 = arith.constant 0 : i32
    %c0_i32_0 = arith.constant 0 : i32
    return %arg0, %c0_i32 : i32, i32
  }
  func.func @transform_1(%arg0: i32) -> (i32, i32) {
    %c0_i32 = arith.constant 0 : i32
    %c0_i32_0 = arith.constant 0 : i32
    %c0_i32_1 = arith.constant 0 : i32
    return %c0_i32, %c0_i32_0 : i32, i32
  }
  func.func @transform_2(%arg0: i32) -> (i32, i32) {
    %c0_i32 = arith.constant 0 : i32
    %c0_i32_0 = arith.constant 0 : i32
    %c0_i32_1 = arith.constant 0 : i32
    return %c0_i32, %c0_i32_0 : i32, i32
  }
  func.func @transform_3(%arg0: i32) -> (i32, i32) {
    %c0_i32 = arith.constant 0 : i32
    %c0_i32_0 = arith.constant 0 : i32
    return %arg0, %c0_i32 : i32, i32
  }
}

</mosaic_0001>

<bundles_post_ra>
// kernel: tpu_custom_call.1
= control target key start
LH: loop header
LB: loop body
LE: loop exit
PB: predicated region body
PF: predicated region fallthrough
CT: control target
= control target key end

     0   :  { %8 = vsyncpa [#allocation3], 0  ;;  %s224_s0 = inlined_call_operand.hbm [shape: f32[16,128], index: 0, kind: input, shape index: {}]   ;;  %s225_s1 = inlined_call_operand.vmem [shape: f32[1,128], index: 1, kind: input, shape index: {}]   ;;  %s226_s2 = inlined_call_operand.vmem [shape: f32[1,128], index: 2, kind: input, shape index: {}]   ;;  %s227_s3 = inlined_call_operand.hbm [shape: bf16[16,128], index: 3, kind: output, shape index: {}]  }
   0x1   :  { %9 = vsyncpa [#allocation4], 0  ;;  %s168_s12 = smov [#allocation2]   ;;  %s120_s16 = scalar_lea.hbm %s224_s0, 256 }
   0x2   :  { %s15_s13 = sshll.u32 %s168_s12, 4  ;;  %p121_p0 = scmp.ne.s32.totalorder %s224_s0, %s120_s16  ;;  %s16_s13 = int_to_ptr.vmem [resolvable:$true] %s15_s13 }
   0x3   :  { %p124_p1 = scmp.lt.u32.totalorder %s120_s16, %s224_s0 }
   0x5   :  { %p126_p2 = pnand %p124_p1, %p121_p0 }
   0x7   :  { %129 = shalt.err (!%p126_p2)
}
   0x8   :  { %s130_s21 = scalar_lea.vmem %s16_s13, 256  ;;  %p135_p4 = scmp.lt.s32.totalorder %s16_s13, %s16_s13 }
   0x9   :  { %p131_p3 = scmp.ne.s32.totalorder %s16_s13, %s130_s21  ;;  %p136_p5 = scmp.lt.s32.totalorder %s130_s21, %s130_s21 }
   0xb   :  { %p137_p6 = por %p136_p5, %p135_p4 }
   0xd   :  { %p138_p7 = pnand %p137_p6, %p131_p3 }
   0xf   :  { %141 = shalt.err (!%p138_p7)
}
  0x10   :  { %s169_s22 = smov 128   ;;  %s170_s23 = smov 8  }
  0x11   :  { %21 = dma.hbm_to_vmem [thread:$0]  %s224_s0, 256, %s16_s13, [#allocation3], %s169_s22, %s169_s22, %s170_s23  }
  0x12   :  { %164 = dma.done.wait [#allocation3], 256  }
  0x13   :  { %165 = vsyncadd [#allocation3], 4294967040  ;;  %v29_v0 = vld [vmem:[#allocation2] sm:$0xff]  ;;  %v30_v1 = vld [vmem:[#allocation2 + $0x8] sm:$0xff]  ;;  %s171_s29 = smov [#allocation5]  }
  0x14   :  { %33 = vadd.xlane.f32.xlu0 %v29_v0  ;;  %v99_v18 = vld [vmem:[%s225_s1] ss:$0 sm:$0xff]  ;;  %s87_s30 = sshll.u32 %s171_s29, 4  ;;  %s88_s30 = int_to_ptr.vmem [resolvable:$true] %s87_s30 }
  0x15   :  { %v100_v22 = vld [vmem:[%s226_s2] ss:$0 sm:$0xff]  ;;  %s142_s4 = scalar_lea.vmem %s88_s30, 128  ;;  %p147_p9 = scmp.lt.s32.totalorder %s88_s30, %s88_s30 }
  0x16   :  { %p143_p8 = scmp.ne.s32.totalorder %s88_s30, %s142_s4  ;;  %p148_p10 = scmp.lt.s32.totalorder %s142_s4, %s142_s4 }
  0x18   :  { %35 = vadd.xlane.f32.xlu0 %v30_v1  ;;  %p149_p11 = por %p148_p10, %p147_p9 }
  0x1a   :  { %p150_p12 = pnand %p149_p11, %p143_p8 }
  0xa1   :  { %v34_v2 = vpop.xlane.xlu0 %33 }
  0xa2   :  { %v38_v3 = vmul.f32 0.0078125, %v34_v2 }
  0xa4   :  { %v40_v4 = vsub.f32 %v29_v0, %v38_v3 }
  0xa5   :  { %v36_v5 = vpop.xlane.xlu0 %35 }
  0xa6   :  { %v39_v6 = vmul.f32 0.0078125, %v36_v5  ;;  %v42_v7 = vmul.f32 %v40_v4, %v40_v4 }
  0xa8   :  { %v41_v8 = vsub.f32 %v30_v1, %v39_v6  ;;  %44 = vadd.xlane.f32.xlu1 %v42_v7 }
  0xaa   :  { %v43_v9 = vmul.f32 %v41_v8, %v41_v8 }
  0xac   :  { %46 = vadd.xlane.f32.xlu1 %v43_v9 }
 0x135   :  { %v45_v10 = vpop.xlane.xlu1 %44 }
 0x136   :  { %v48_v11 = vmul.f32 0.0078125, %v45_v10 }
 0x138   :  { %v50_v12 = vadd.f32 1e-12, %v48_v11 }
 0x139   :  { %v47_v13 = vpop.xlane.xlu1 %46 }
 0x13a   :  { %116 = vrsqrt.f32 %v50_v12  ;;  %v49_v14 = vmul.f32 0.0078125, %v47_v13 }
 0x13c   :  { %v51_v15 = vadd.f32 1e-12, %v49_v14 }
 0x13e   :  { %118 = vrsqrt.f32 %v51_v15 }
 0x144   :  { %v117_v16 = vpop.eup %116 }
 0x145   :  { %v54_v17 = vmul.f32 %v117_v16, %v40_v4 }
 0x147   :  { %v62_v21 = vmul.f32 %v99_v18, %v54_v17 }
 0x148   :  { %v119_v19 = vpop.eup %118 }
 0x149   :  { %v55_v20 = vmul.f32 %v119_v19, %v41_v8  ;;  %v70_v24 = vadd.f32 %v100_v22, %v62_v21 }
 0x14b   :  { %v63_v23 = vmul.f32 %v99_v18, %v55_v20 }
 0x14d   :  { %v71_v25 = vadd.f32 %v100_v22, %v63_v23 }
 0x14f   :  { %v108_v26 = vpack.c.bf16 %v71_v25, %v70_v24 }
 0x151   :  { %109 = vst [vmem:[#allocation5] sm:$0xff] %v108_v26  }
 0x152   :  { %153 = shalt.err (!%p150_p12)
}
 0x153   :  { %s154_s6 = scalar_lea.hbm %s227_s3, 128 }
 0x154   :  { %p155_p13 = scmp.ne.s32.totalorder %s227_s3, %s154_s6  ;;  %p158_p0 = scmp.lt.u32.totalorder %s154_s6, %s227_s3 }
 0x156   :  { %p160_p1 = pnand %p158_p0, %p155_p13 }
 0x158   :  { %163 = shalt.err (!%p160_p1)
}
 0x159   :  { %s172_s10 = smov 64   ;;  %s173_s11 = smov 4  }
 0x15a   :  { %93 = dma.vmem_to_hbm [thread:$0]  %s88_s30, 128, %s227_s3, [#allocation4], %s172_s10, %s172_s10, %s173_s11  }
 0x15b   :  { %166 = dma.done.wait [#allocation4], 128  }
 0x15c   :  { %167 = vsyncadd [#allocation4], 4294967168 }
 0x15d   :  { %97 = vsyncpa [#allocation3], 1 }
 0x15e   :  { %98 = vsyncpa [#allocation4], 1 }

</bundles_post_ra>
